<compile_context>
chip_gen: v7x
topology: tpu7x:2x2x1
jax: 0.10.0
libtpu: 0.0.40
codegen_flags: <defaults>
</compile_context>

<pallas_src>
import jax
import jax.numpy as jnp
from jax.experimental import pallas as pl
from jax.experimental.pallas import tpu as pltpu


def _sigmoid_f32(x):
    # tanh form: single EUP transcendental + cheap VALU mul/add; saturating (no inf
    # from exp overflow, no divide on the VALU).
    return 0.5 * jnp.tanh(0.5 * x) + 0.5


def ffn_v2_kernel(x_ref, w1_ref, w2_ref, w3_ref, wh1_ref, p_ref, out_ref):
    x = x_ref[...]            # (F, tb) bf16, batch along lanes
    p = p_ref[...]            # (64, 8) f32 packed params

    b1 = p[:, 0:1]            # (64, 1)
    b2 = p[:, 1:2]            # (64, 1)
    b3 = p[:32, 2:3]          # (32, 1)
    bh1 = p[:32, 3:4]         # (32, 1)  rows 0:16 = bl1, rows 16:32 = bt1
    wfin = p[:32, 4:5]        # (32, 1)  rows 0:16 = wl2, rows 16:32 = wt2
    bfin = p[:2, 5:6]         # (2, 1)   [bl2, bt2]

    # trunk: Linear -> Sigmoid (x3)   (Dropout == identity at inference)
    h = _sigmoid_f32(jnp.dot(w1_ref[...], x,
                             preferred_element_type=jnp.float32) + b1)          # (64, tb)
    h = _sigmoid_f32(jnp.dot(w2_ref[...], h.astype(jnp.bfloat16),
                             preferred_element_type=jnp.float32) + b2)          # (64, tb)
    h = _sigmoid_f32(jnp.dot(w3_ref[...], h.astype(jnp.bfloat16),
                             preferred_element_type=jnp.float32) + b3)          # (32, tb)

    # fused head hidden layers: rows 0:16 = long head, rows 16:32 = lat head
    s = _sigmoid_f32(jnp.dot(wh1_ref[...], h.astype(jnp.bfloat16),
                             preferred_element_type=jnp.float32) + bh1)         # (32, tb)

    # final (16 -> 1) layers off the MXU: VPU multiply + XLU sublane reduce
    prod = s * wfin                                                             # (32, tb)
    long_row = jnp.sum(prod[:16, :], axis=0, keepdims=True)                     # (1, tb)
    lat_row = jnp.sum(prod[16:, :], axis=0, keepdims=True)                      # (1, tb)
    out_ref[...] = jnp.concatenate([long_row, lat_row], axis=0) + bfin          # (2, tb)


def _choose_tile(B, cap):
    """tb must be a multiple of 128 (lane-dense (F,tb)/(2,tb) blocks) or equal B."""
    cap = max(128, (int(cap) // 128) * 128)
    if B <= 128:
        return B                      # single full-array tile
    # >= 2 grid steps so ("parallel",) gives both v7x TensorCores work
    return min(cap, 128 * pl.cdiv(pl.cdiv(B, 2), 128))


def ffn_v2_forward(x, packed_params, tile_b=4096):
    """x: (B, F) or (B, seq_len, dim_in).  Returns [long, lat], each shape (B,)."""
    w1, w2, w3, wh1, p = packed_params
    B = x.shape[0]
    if x.ndim == 3:
        x = x.reshape(B, -1)
    F = x.shape[1]
    assert F == w1.shape[1], (F, w1.shape)

    # feature-major, bf16: lane-dense batch axis, half the input DMA bytes
    x_t = jnp.transpose(x.astype(jnp.bfloat16))            # (F, B)

    tb = _choose_tile(B, tile_b)
    grid = (pl.cdiv(B, tb),)
    const = lambda i: (0, 0)

    flops = 2 * B * (F * 64 + 64 * 64 + 64 * 32 + 32 * 32 + 32)
    transcendentals = B * (64 + 64 + 32 + 32)
    bytes_accessed = (B * F + w1.size + w2.size + w3.size + wh1.size) * 2 \
        + p.size * 4 + 2 * B * 4

    out = pl.pallas_call(
        ffn_v2_kernel,
        out_shape=jax.ShapeDtypeStruct((2, B), jnp.float32),
        grid=grid,
        in_specs=[
            pl.BlockSpec((F, tb), lambda i: (0, i)),   # activations, pipelined over batch
            pl.BlockSpec(w1.shape, const),             # weights/params VMEM-resident
            pl.BlockSpec(w2.shape, const),
            pl.BlockSpec(w3.shape, const),
            pl.BlockSpec(wh1.shape, const),
            pl.BlockSpec(p.shape, const),
        ],
        out_specs=pl.BlockSpec((2, tb), lambda i: (0, i)),
        compiler_params=pltpu.CompilerParams(dimension_semantics=("parallel",)),
        cost_estimate=pl.CostEstimate(flops=flops,
                                      transcendentals=transcendentals,
                                      bytes_accessed=bytes_accessed),
    )(x_t, w1, w2, w3, wh1, p)

    return [out[0], out[1]]


def init_params(key, dim_in=7, seq_len=1):
    """Xavier-normal weights in torch layout (out, in).  Torch init zeroes biases;
    small random biases are used here so the kernel's bias plumbing is exercised."""
    dims = [(64, dim_in * seq_len), (64, 64), (32, 64),    # main
            (16, 32), (1, 16),                             # main_long
            (16, 32), (1, 16)]                             # main_lat
    keys = jax.random.split(key, 2 * len(dims))
    ws, bs = [], []
    for idx, (fo, fi) in enumerate(dims):
        std = (2.0 / (fi + fo)) ** 0.5
        ws.append(std * jax.random.normal(keys[2 * idx], (fo, fi), dtype=jnp.float32))
        bs.append(0.1 * jax.random.normal(keys[2 * idx + 1], (fo,), dtype=jnp.float32))
    return ws, bs


def pack_params(ws, bs):
    """Fuse the two heads, cast matmul weights to bf16, and pack all biases plus the
    final 16-wide head weights/biases into a single (64, 8) f32 array."""
    w1, w2, w3, wl1, wl2, wt1, wt2 = ws
    b1, b2, b3, bl1, bl2, bt1, bt2 = bs

    wh1 = jnp.concatenate([wl1, wt1], axis=0)              # (32, 32): rows 0:16 long

    p = jnp.zeros((64, 8), jnp.float32)
    p = p.at[:64, 0].set(b1)
    p = p.at[:64, 1].set(b2)
    p = p.at[:32, 2].set(b3)
    p = p.at[:16, 3].set(bl1).at[16:32, 3].set(bt1)
    p = p.at[:16, 4].set(wl2[0]).at[16:32, 4].set(wt2[0])
    p = p.at[0, 5].set(bl2[0]).at[1, 5].set(bt2[0])

    bf = jnp.bfloat16
    return (w1.astype(bf), w2.astype(bf), w3.astype(bf), wh1.astype(bf), p)


def reference_forward(x, ws, bs):
    """Pure-JAX f32 reference on the unfused torch-layout parameters."""
    B = x.shape[0]
    if x.ndim == 3:
        x = x.reshape(B, -1)
    x = x.astype(jnp.float32)
    w1, w2, w3, wl1, wl2, wt1, wt2 = ws
    b1, b2, b3, bl1, bl2, bt1, bt2 = bs
    sig = jax.nn.sigmoid
    h = sig(x @ w1.T + b1)
    h = sig(h @ w2.T + b2)
    h = sig(h @ w3.T + b3)
    long = (sig(h @ wl1.T + bl1) @ wl2.T + bl2).reshape(-1)
    lat = (sig(h @ wt1.T + bt1) @ wt2.T + bt2).reshape(-1)
    return long, lat


if __name__ == "__main__":
    dim_in, seq_len = 7, 1

    key = jax.random.PRNGKey(0)
    k_params, k_x1, k_x2 = jax.random.split(key, 3)

    ws, bs = init_params(k_params, dim_in=dim_in, seq_len=seq_len)
    packed = pack_params(ws, bs)

    # Case 1: 3-D input (B, seq_len, dim_in) with B=300 -> 2-step grid (tb=256) and a
    # partial last tile, exercising the torch 3-D reshape path and megacore split.
    x1 = jax.random.normal(k_x1, (300, seq_len, dim_in), dtype=jnp.float32)
    long1, lat1 = ffn_v2_forward(x1, packed)

    # Case 2: small 2-D batch -> single full-array tile (tb = B).
    x2 = jax.random.normal(k_x2, (24, dim_in * seq_len), dtype=jnp.float32)
    long2, lat2 = ffn_v2_forward(x2, packed)

    jax.block_until_ready((long1, lat1, long2, lat2))

    r1_long, r1_lat = reference_forward(x1, ws, bs)
    r2_long, r2_lat = reference_forward(x2, ws, bs)

    assert long1.shape == (300,) and lat1.shape == (300,)
    assert long2.shape == (24,) and lat2.shape == (24,)
    # bf16 matmul inputs -> loosened tolerance vs the f32 reference.
    assert jnp.allclose(long1, r1_long, atol=2e-2, rtol=2e-2)
    assert jnp.allclose(lat1, r1_lat, atol=2e-2, rtol=2e-2)
    assert jnp.allclose(long2, r2_long, atol=2e-2, rtol=2e-2)
    assert jnp.allclose(lat2, r2_lat, atol=2e-2, rtol=2e-2)

    print("KERNEL_OK")
</pallas_src>

<mosaic_0001>
module attributes {stable_mosaic.version = 11 : i64} {
  func.func @ffn_v2_kernel(%arg0: i32, %arg1: memref<7x256xbf16, #tpu.memory_space<vmem>>, %arg2: memref<64x7xbf16, #tpu.memory_space<vmem>>, %arg3: memref<64x64xbf16, #tpu.memory_space<vmem>>, %arg4: memref<32x64xbf16, #tpu.memory_space<vmem>>, %arg5: memref<32x32xbf16, #tpu.memory_space<vmem>>, %arg6: memref<64x8xf32, #tpu.memory_space<vmem>>, %arg7: memref<2x256xf32, #tpu.memory_space<vmem>>) attributes {dimension_semantics = [#tpu.dimension_semantics<parallel>], iteration_bounds = array<i64: 2>, scalar_prefetch = 0 : i64, scratch_operands = 0 : i64, tpu.core_type = #tpu.core_type<tc>, window_params = [{transform_indices = @transform_0, window_bounds = array<i64: 7, 256>}, {pipeline_mode = #tpu.pipeline_mode<synchronous>, transform_indices = @transform_1, window_bounds = array<i64: 64, 7>}, {pipeline_mode = #tpu.pipeline_mode<synchronous>, transform_indices = @transform_2, window_bounds = array<i64: 64, 64>}, {pipeline_mode = #tpu.pipeline_mode<synchronous>, transform_indices = @transform_3, window_bounds = array<i64: 32, 64>}, {pipeline_mode = #tpu.pipeline_mode<synchronous>, transform_indices = @transform_4, window_bounds = array<i64: 32, 32>}, {pipeline_mode = #tpu.pipeline_mode<synchronous>, transform_indices = @transform_5, window_bounds = array<i64: 64, 8>}, {transform_indices = @transform_6, window_bounds = array<i64: 2, 256>}]} {
    %c0 = arith.constant 0 : index
    %c0_0 = arith.constant 0 : index
    %0 = vector.load %arg1[%c0, %c0_0] : memref<7x256xbf16, #tpu.memory_space<vmem>>, vector<7x256xbf16>
    %c0_1 = arith.constant 0 : index
    %c0_2 = arith.constant 0 : index
    %1 = vector.load %arg6[%c0_1, %c0_2] : memref<64x8xf32, #tpu.memory_space<vmem>>, vector<64x8xf32>
    %2 = vector.extract_strided_slice %1 {offsets = [0, 0], sizes = [64, 1], strides = [1, 1]} : vector<64x8xf32> to vector<64x1xf32>
    %3 = vector.extract_strided_slice %1 {offsets = [0, 1], sizes = [64, 1], strides = [1, 1]} : vector<64x8xf32> to vector<64x1xf32>
    %4 = vector.extract_strided_slice %1 {offsets = [0, 2], sizes = [32, 1], strides = [1, 1]} : vector<64x8xf32> to vector<32x1xf32>
    %5 = vector.extract_strided_slice %1 {offsets = [0, 3], sizes = [32, 1], strides = [1, 1]} : vector<64x8xf32> to vector<32x1xf32>
    %6 = vector.extract_strided_slice %1 {offsets = [0, 4], sizes = [32, 1], strides = [1, 1]} : vector<64x8xf32> to vector<32x1xf32>
    %7 = vector.extract_strided_slice %1 {offsets = [0, 5], sizes = [2, 1], strides = [1, 1]} : vector<64x8xf32> to vector<2x1xf32>
    %c0_3 = arith.constant 0 : index
    %c0_4 = arith.constant 0 : index
    %8 = vector.load %arg2[%c0_3, %c0_4] : memref<64x7xbf16, #tpu.memory_space<vmem>>, vector<64x7xbf16>
    %cst = arith.constant dense<0.000000e+00> : vector<64x256xf32>
    %9 = tpu.matmul %8, %0, %cst {dimension_numbers = #tpu.dot_dimension_numbers<[1], [0], [0], [1], [0, 0, 1, 1], [], []>} : vector<64x7xbf16>, vector<7x256xbf16>, vector<64x256xf32> -> vector<64x256xf32>
    %10 = vector.broadcast %2 : vector<64x1xf32> to vector<64x256xf32>
    %11 = arith.addf %9, %10 : vector<64x256xf32>
    %cst_5 = arith.constant 5.000000e-01 : f32
    %12 = vector.broadcast %cst_5 : f32 to vector<64x256xf32>
    %13 = arith.mulf %12, %11 : vector<64x256xf32>
    %14 = math.tanh %13 : vector<64x256xf32>
    %cst_6 = arith.constant 5.000000e-01 : f32
    %15 = vector.broadcast %cst_6 : f32 to vector<64x256xf32>
    %16 = arith.mulf %15, %14 : vector<64x256xf32>
    %cst_7 = arith.constant 5.000000e-01 : f32
    %17 = vector.broadcast %cst_7 : f32 to vector<64x256xf32>
    %18 = arith.addf %16, %17 : vector<64x256xf32>
    %c0_8 = arith.constant 0 : index
    %c0_9 = arith.constant 0 : index
    %19 = vector.load %arg3[%c0_8, %c0_9] : memref<64x64xbf16, #tpu.memory_space<vmem>>, vector<64x64xbf16>
    %20 = arith.truncf %18 : vector<64x256xf32> to vector<64x256xbf16>
    %cst_10 = arith.constant dense<0.000000e+00> : vector<64x256xf32>
    %21 = tpu.matmul %19, %20, %cst_10 {dimension_numbers = #tpu.dot_dimension_numbers<[1], [0], [0], [1], [0, 0, 1, 1], [], []>} : vector<64x64xbf16>, vector<64x256xbf16>, vector<64x256xf32> -> vector<64x256xf32>
    %22 = vector.broadcast %3 : vector<64x1xf32> to vector<64x256xf32>
    %23 = arith.addf %21, %22 : vector<64x256xf32>
    %cst_11 = arith.constant 5.000000e-01 : f32
    %24 = vector.broadcast %cst_11 : f32 to vector<64x256xf32>
    %25 = arith.mulf %24, %23 : vector<64x256xf32>
    %26 = math.tanh %25 : vector<64x256xf32>
    %cst_12 = arith.constant 5.000000e-01 : f32
    %27 = vector.broadcast %cst_12 : f32 to vector<64x256xf32>
    %28 = arith.mulf %27, %26 : vector<64x256xf32>
    %cst_13 = arith.constant 5.000000e-01 : f32
    %29 = vector.broadcast %cst_13 : f32 to vector<64x256xf32>
    %30 = arith.addf %28, %29 : vector<64x256xf32>
    %c0_14 = arith.constant 0 : index
    %c0_15 = arith.constant 0 : index
    %31 = vector.load %arg4[%c0_14, %c0_15] : memref<32x64xbf16, #tpu.memory_space<vmem>>, vector<32x64xbf16>
    %32 = arith.truncf %30 : vector<64x256xf32> to vector<64x256xbf16>
    %cst_16 = arith.constant dense<0.000000e+00> : vector<32x256xf32>
    %33 = tpu.matmul %31, %32, %cst_16 {dimension_numbers = #tpu.dot_dimension_numbers<[1], [0], [0], [1], [0, 0, 1, 1], [], []>} : vector<32x64xbf16>, vector<64x256xbf16>, vector<32x256xf32> -> vector<32x256xf32>
    %34 = vector.broadcast %4 : vector<32x1xf32> to vector<32x256xf32>
    %35 = arith.addf %33, %34 : vector<32x256xf32>
    %cst_17 = arith.constant 5.000000e-01 : f32
    %36 = vector.broadcast %cst_17 : f32 to vector<32x256xf32>
    %37 = arith.mulf %36, %35 : vector<32x256xf32>
    %38 = math.tanh %37 : vector<32x256xf32>
    %cst_18 = arith.constant 5.000000e-01 : f32
    %39 = vector.broadcast %cst_18 : f32 to vector<32x256xf32>
    %40 = arith.mulf %39, %38 : vector<32x256xf32>
    %cst_19 = arith.constant 5.000000e-01 : f32
    %41 = vector.broadcast %cst_19 : f32 to vector<32x256xf32>
    %42 = arith.addf %40, %41 : vector<32x256xf32>
    %c0_20 = arith.constant 0 : index
    %c0_21 = arith.constant 0 : index
    %43 = vector.load %arg5[%c0_20, %c0_21] : memref<32x32xbf16, #tpu.memory_space<vmem>>, vector<32x32xbf16>
    %44 = arith.truncf %42 : vector<32x256xf32> to vector<32x256xbf16>
    %cst_22 = arith.constant dense<0.000000e+00> : vector<32x256xf32>
    %45 = tpu.matmul %43, %44, %cst_22 {dimension_numbers = #tpu.dot_dimension_numbers<[1], [0], [0], [1], [0, 0, 1, 1], [], []>} : vector<32x32xbf16>, vector<32x256xbf16>, vector<32x256xf32> -> vector<32x256xf32>
    %46 = vector.broadcast %5 : vector<32x1xf32> to vector<32x256xf32>
    %47 = arith.addf %45, %46 : vector<32x256xf32>
    %cst_23 = arith.constant 5.000000e-01 : f32
    %48 = vector.broadcast %cst_23 : f32 to vector<32x256xf32>
    %49 = arith.mulf %48, %47 : vector<32x256xf32>
    %50 = math.tanh %49 : vector<32x256xf32>
    %cst_24 = arith.constant 5.000000e-01 : f32
    %51 = vector.broadcast %cst_24 : f32 to vector<32x256xf32>
    %52 = arith.mulf %51, %50 : vector<32x256xf32>
    %cst_25 = arith.constant 5.000000e-01 : f32
    %53 = vector.broadcast %cst_25 : f32 to vector<32x256xf32>
    %54 = arith.addf %52, %53 : vector<32x256xf32>
    %55 = vector.broadcast %6 : vector<32x1xf32> to vector<32x256xf32>
    %56 = arith.mulf %54, %55 : vector<32x256xf32>
    %57 = vector.extract_strided_slice %56 {offsets = [0, 0], sizes = [16, 256], strides = [1, 1]} : vector<32x256xf32> to vector<16x256xf32>
    %cst_26 = arith.constant dense<0.000000e+00> : vector<256xf32>
    %58 = vector.multi_reduction <add>, %57, %cst_26 [0] : vector<16x256xf32> to vector<256xf32>
    %59 = vector.shape_cast %58 : vector<256xf32> to vector<1x256xf32>
    %60 = vector.extract_strided_slice %56 {offsets = [16, 0], sizes = [16, 256], strides = [1, 1]} : vector<32x256xf32> to vector<16x256xf32>
    %cst_27 = arith.constant dense<0.000000e+00> : vector<256xf32>
    %61 = vector.multi_reduction <add>, %60, %cst_27 [0] : vector<16x256xf32> to vector<256xf32>
    %62 = vector.shape_cast %61 : vector<256xf32> to vector<1x256xf32>
    %63 = tpu.concatenate %59, %62 in 0 : vector<1x256xf32>, vector<1x256xf32> -> vector<2x256xf32>
    %64 = vector.broadcast %7 : vector<2x1xf32> to vector<2x256xf32>
    %65 = arith.addf %63, %64 : vector<2x256xf32>
    %c0_28 = arith.constant 0 : index
    %c0_29 = arith.constant 0 : index
    %66 = vector.load %arg7[%c0_28, %c0_29] : memref<2x256xf32, #tpu.memory_space<vmem>>, vector<2x256xf32>
    tpu.vector_store %arg7[%c0_28, %c0_29], %65 {strides = array<i32>} : memref<2x256xf32, #tpu.memory_space<vmem>>, vector<2x256xf32>,
    return
  }
  func.func @transform_0(%arg0: i32) -> (i32, i32) {
    %c0_i32 = arith.constant 0 : i32
    %c0_i32_0 = arith.constant 0 : i32
    return %c0_i32, %arg0 : i32, i32
  }
  func.func @transform_1(%arg0: i32) -> (i32, i32) {
    %c0_i32 = arith.constant 0 : i32
    %c0_i32_0 = arith.constant 0 : i32
    %c0_i32_1 = arith.constant 0 : i32
    return %c0_i32, %c0_i32_0 : i32, i32
  }
  func.func @transform_2(%arg0: i32) -> (i32, i32) {
    %c0_i32 = arith.constant 0 : i32
    %c0_i32_0 = arith.constant 0 : i32
    %c0_i32_1 = arith.constant 0 : i32
    return %c0_i32, %c0_i32_0 : i32, i32
  }
  func.func @transform_3(%arg0: i32) -> (i32, i32) {
    %c0_i32 = arith.constant 0 : i32
    %c0_i32_0 = arith.constant 0 : i32
    %c0_i32_1 = arith.constant 0 : i32
    return %c0_i32, %c0_i32_0 : i32, i32
  }
  func.func @transform_4(%arg0: i32) -> (i32, i32) {
    %c0_i32 = arith.constant 0 : i32
    %c0_i32_0 = arith.constant 0 : i32
    %c0_i32_1 = arith.constant 0 : i32
    return %c0_i32, %c0_i32_0 : i32, i32
  }
  func.func @transform_5(%arg0: i32) -> (i32, i32) {
    %c0_i32 = arith.constant 0 : i32
    %c0_i32_0 = arith.constant 0 : i32
    %c0_i32_1 = arith.constant 0 : i32
    return %c0_i32, %c0_i32_0 : i32, i32
  }
  func.func @transform_6(%arg0: i32) -> (i32, i32) {
    %c0_i32 = arith.constant 0 : i32
    %c0_i32_0 = arith.constant 0 : i32
    return %c0_i32, %arg0 : i32, i32
  }
}

</mosaic_0001>

<bundles_post_ra>
// kernel: tpu_custom_call.1
= control target key start
LH: loop header
LB: loop body
LE: loop exit
PB: predicated region body
PF: predicated region fallthrough
CT: control target
= control target key end

     0   :  { %11 = vsyncpa [#allocation3], 0  ;;  %s1695_s0 = inlined_call_operand.vmem [shape: bf16[7,300], index: 0, kind: input, shape index: {}]   ;;  %s1696_s1 = inlined_call_operand.vmem [shape: bf16[64,7], index: 1, kind: input, shape index: {}]   ;;  %s1697_s2 = inlined_call_operand.vmem [shape: bf16[64,64], index: 2, kind: input, shape index: {}]   ;;  %s1698_s3 = inlined_call_operand.vmem [shape: bf16[32,64], index: 3, kind: input, shape index: {}]   ;;  %s1699_s4 = inlined_call_operand.vmem [shape: bf16[32,32], index: 4, kind: input, shape index: {}]   ;;  %s1700_s5 = inlined_call_operand.vmem [shape: f32[64,8], index: 5, kind: input, shape index: {}]   ;;  %s1701_s6 = inlined_call_operand.hbm [shape: f32[2,300], index: 6, kind: output, shape index: {}]  }
   0x1   :  { %13 = vsyncpa [#allocation3 + $0x1], 0  ;;  %s1467_s21 = smov 0   ;;  %s1469_s22 = smov 0  }
   0x2   :  { %s1471_s23 = smov 0   ;;  %s1473_s24 = smov 0  }
   0x3 LB: > { %s1488_s25 = sadd.s32 4294967295, %s1422_s24   ;;  %s1146_s26 = sadd.s32 4294967294, %s1422_s24   ;;  %s1422_s24 = sphi %s1473_s24, %s1707_s24   ;;  %s1418_s23 = sphi %s1471_s23, %s1706_s23   ;;  %s1414_s22 = sphi %s1469_s22, %s1705_s22   ;;  %s1410_s21 = sphi %s1467_s21, %s1704_s21  }
   0x4   : > { %s1492_s27 = sadd.s32 1, %s1422_s24   ;;  %s157_s28 = sadd.s32 1, %s1418_s23 }
   0x5   : > { %s154_s29 = ssub.s32 %s1422_s24, %s1492_s27  ;;  %p167_p0 = scmp.ne.s32.totalorder %s1418_s23, %s1414_s22 }
   0x6   : > { %p155_p1 = scmp.eq.s32.totalorder %s154_s29, 0  ;;  %p168_p2 = scmp.eq.s32.totalorder %s1488_s25, 1 }
   0x7   : > { %p173_p3 = scmp.ne.s32.totalorder %s1414_s22, %s1410_s21  ;;  %p174_p4 = scmp.eq.s32.totalorder %s1146_s26, 1 }
   0x8   : > { %s1503_s30 = scalar_select %p155_p1, %s1418_s23, %s157_s28  }
   0x9   : > { %p1505_p5 = por %p168_p2, %p167_p0  ;;  %p1509_p6 = por %p174_p4, %p173_p3 }
   0xa   : > { %p1149_p7 = scmp.ge.s32.totalorder %s1422_s24, 1  ;;  %p224_p8 = scmp.lt.s32.totalorder %s1422_s24, 3 }
   0xc   : > { %p225_p9 = pnand %p1149_p7, %p224_p8 }
   0xd   : > { %s1516_s9 = sshll.u32 (!%p225_p9), %s1488_s25, 1  ;;  %vm373_vm0 = vcmask (!%p225_p9), 1042432   ;;  %v1424_v0 = vmov (!%p225_p9), 0   ;;  %vm374_vm1 = vcmask (!%p225_p9), 1043456   ;;  %v1425_v1 = vmov (!%p225_p9), 65535   ;;  %v1527_v3 = vld [vmem:[%s1700_s5] sm:$0xff] (!%p225_p9) }
   0xe   : > { %228 = sbr.rel (%p225_p9) target bundleno = 1097 (0x449), region = 44  ;;  %p263_p10 = scmp.lt.s32.totalorder (!%p225_p9), %s1516_s9, 2  ;;  %415 = vmatprep.mubr.bf16.mxu0 (!%p225_p9), %v1424_v0  ;;  %1239 = vset.pattern.permute.xlu0 (!%p225_p9), %v1424_v0  ;;  %v375_v2 = vsel (!%p225_p9), %vm373_vm0, 4294967295, %v1425_v1  ;;  %v1536_v4 = vld [vmem:[%s1700_s5 + $0x10] sm:$0xff] (!%p225_p9)  ;;  %v1541_v7 = vld [vmem:[%s1700_s5 + $0x8] sm:$0xff] (!%p225_p9)  ;;  %v1547_v10 = vld [vmem:[%s1700_s5 + $0x18] sm:$0xff] (!%p225_p9) }
   0xf   : > { %1240 = vset.pattern.permute.xlu1 (!%p225_p9), %v1424_v0  ;;  %633 = vmatprep.mubr.bf16.mxu1 (!%p225_p9), %v1424_v0  ;;  %v376_v6 = vsel (!%p225_p9), %vm374_vm1, %v375_v2, 0  ;;  %v283_v11 = vld [vmem:[%s1700_s5 + $0x20] sm:$0xff] (!%p225_p9)  ;;  %v284_v15 = vld [vmem:[%s1700_s5 + $0x28] sm:$0xff] (!%p225_p9)  ;;  %vm360_vm2 = vcmask (!%p225_p9), 56320   ;;  %v285_v16 = vld [vmem:[%s1700_s5 + $0x30] sm:$0xff] (!%p225_p9)  ;;  %v1426_v21 = vmov (!%p225_p9), 1  }
  0x10   : > { %297 = vperm.xlu0 (!%p225_p9), %1239, %v1527_v3   ;;  %307 = vperm.xlu1 (!%p225_p9), %1240, %v1536_v4   ;;  %v1252_v14 = vld [vmem:[%s1696_s1] sm:$0xff] (!%p225_p9)   ;;  %v286_v17 = vld [vmem:[%s1700_s5 + $0x38] sm:$0xff] (!%p225_p9)  ;;  %v1253_v18 = vld [vmem:[%s1696_s1 + $0x8] sm:$0xff] (!%p225_p9)   ;;  %vm588_vm3 = vcmask (!%p225_p9), 523264   ;;  %vm901_vm4 = vcmask (!%p225_p9), 261120   ;;  %s255_s13 = sand.u32 (!%p225_p9), 1, %s1414_s22  }
  0x11   : > { %v1254_v19 = vld [vmem:[%s1696_s1 + $0x10] sm:$0xff] (!%p225_p9)   ;;  %v1255_v20 = vld [vmem:[%s1696_s1 + $0x18] sm:$0xff] (!%p225_p9)   ;;  %vm1045_vm5 = vcmask (!%p225_p9), 1040384   ;;  %s1150_s14 = sshll.u32 (!%p225_p9), %s255_s13, 2 }
  0x12   : > { %s257_s15 = scalar_lea.vmem (!%p225_p9), [#allocation2], %s1150_s14 }
  0x14   : > { %302 = vperm.xlu0 (!%p225_p9), %1239, %v1541_v7   ;;  %312 = vperm.xlu1 (!%p225_p9), %1240, %v1547_v10  }
  0x15   : > { %s264_s10 = scalar_select %p263_p10, %s1516_s9, 2 }
  0x16   : > { %s1075_s17 = ssub.s32 (%p1505_p5), 3, %s1516_s9 }
  0x17   : > { %s1152_s11 = sshll.u32 %s264_s10, 2  ;;  %p1076_p11 = scmp.lt.s32.totalorder (%p1505_p5), %s1075_s17, 2 }
  0x18   : > { %s266_s16 = scalar_lea.vmem %s1695_s0, %s1152_s11  ;;  %317 = vperm.xlu0 %1239, %v283_v11   ;;  %322 = vperm.xlu1 %1240, %v284_v15  }
  0x19   : > { %v278_v5 = vld [vmem:[%s266_s16] sm:$0xff]  ;;  %s1641_s16 = scalar_lea.sflag [#allocation3], %s255_s13 }
  0x1a   : > { %v1158_v8 = vcombine.high %v278_v5, %v278_v5  ;;  %v1157_v9 = vcombine.low %v278_v5, %v278_v5 }
  0x1c   : > { %v381_v12 = vand.u32 %v1158_v8, %v376_v6  ;;  %v378_v13 = vand.u32 %v1157_v9, %v376_v6  ;;  %327 = vperm.xlu0 %1239, %v285_v16   ;;  %332 = vperm.xlu1 %1240, %v286_v17  }
  0x1e   : > { %383 = vmatprep.subr.bf16.mxu0 %v381_v12 }
  0x1f   : > { %384 = vmatpush1.bf16.msra.mxu0 %v378_v13 }
  0x20   : > { %1241 = vset.pattern.permute.xlu0 %v1426_v21  ;;  %1242 = vset.pattern.permute.xlu1 %v1426_v21 }
  0x21   : > { %537 = vperm.xlu0 %1241, %v1527_v3   ;;  %541 = vperm.xlu1 %1242, %v1541_v7  }
  0x22   : > { %1159 = vmatmul.mubr.msk.bf16.vlgmr.msra.gmra.mrb[0].mxu0 %vm360_vm2, %v1252_v14 }
  0x23   : > { %425 = vmatprep.mubr.bf16.mxu0 %v1424_v0 }
  0x25   : > { %545 = vperm.xlu1 %1242, %v1536_v4   ;;  %549 = vperm.xlu0 %1241, %v1547_v10  }
  0x29   : > { %553 = vperm.xlu1 %1242, %v283_v11   ;;  %557 = vperm.xlu0 %1241, %v284_v15  }
  0x2a   : > { %1160 = vmatmul.mubr.msk.bf16.gmra.mrb[4].mxu0 %vm360_vm2, %v1253_v18 }
  0x2b   : > { %435 = vmatprep.mubr.bf16.mxu0 %v1424_v0 }
  0x2d   : > { %561 = vperm.xlu1 %1242, %v285_v16   ;;  %565 = vperm.xlu0 %1241, %v286_v17  }
  0x32   : > { %1161 = vmatmul.mubr.msk.bf16.gmra.mrb[8].mxu0 %vm360_vm2, %v1254_v19 }
  0x33   : > { %445 = vmatprep.mubr.bf16.mxu0 %v1424_v0 }
  0x3a   : > { %1162 = vmatmul.mubr.msk.bf16.gmra.mrb[12].mxu0 %vm360_vm2, %v1255_v20 }
  0x3b   : > { %814 = vmatprep.mubr.bf16.mxu0 %v1424_v0 }
  0x8f   : > { %v298_v22 = vpop.permute.xlu0 %297  ;;  %v308_v33 = vpop.permute.xlu1 %307 }
  0x93   : > { %v303_v24 = vpop.permute.xlu0 %302  ;;  %v313_v40 = vpop.permute.xlu1 %312 }
  0x97   : > { %v318_v52 = vpop.permute.xlu0 %317  ;;  %v323_v60 = vpop.permute.xlu1 %322 }
  0xf5   : > { %v417_v23 = vpop.f32.mrb[0].mxu0 }
  0xf6   : > { %v418_v25 = vadd.f32 %v417_v23, %v298_v22  ;;  %v419_v26 = vpop.f32.mrb[1].mxu0 }
  0xf7   : > { %v420_v27 = vadd.f32 %v419_v26, %v298_v22  ;;  %v421_v28 = vpop.f32.mrb[2].mxu0  ;;  %v328_v22 = vpop.permute.xlu0 %327 }
  0xf8   : > { %v456_v29 = vmul.f32 0.5, %v418_v25  ;;  %v422_v30 = vadd.f32 %v421_v28, %v303_v24  ;;  %v423_v31 = vpop.f32.mrb[3].mxu0 }
  0xf9   : > { %v457_v32 = vmul.f32 0.5, %v420_v27  ;;  %v424_v34 = vadd.f32 %v423_v31, %v303_v24 }
  0xfa   : > { %1264 = vtanh.f32 %v456_v29  ;;  %v458_v35 = vmul.f32 0.5, %v422_v30  ;;  %v333_v30 = vpop.permute.xlu1 %332 }
  0xfb   : > { %1266 = vtanh.f32 %v457_v32  ;;  %v459_v36 = vmul.f32 0.5, %v424_v34 }
  0xfc   : > { %1268 = vtanh.f32 %v458_v35 }
  0xfd   : > { %1270 = vtanh.f32 %v459_v36  ;;  %v427_v37 = vpop.f32.mrb[4].mxu0 }
  0xfe   : > { %v428_v38 = vadd.f32 %v427_v37, %v308_v33  ;;  %v429_v39 = vpop.f32.mrb[5].mxu0 }
  0xff   : > { %v430_v41 = vadd.f32 %v429_v39, %v308_v33  ;;  %v431_v42 = vpop.f32.mrb[6].mxu0 }
 0x100   : > { %v460_v43 = vmul.f32 0.5, %v428_v38  ;;  %v432_v44 = vadd.f32 %v431_v42, %v313_v40  ;;  %v433_v45 = vpop.f32.mrb[7].mxu0 }
 0x101   : > { %v461_v46 = vmul.f32 0.5, %v430_v41  ;;  %v434_v47 = vadd.f32 %v433_v45, %v313_v40 }
 0x102   : > { %1272 = vtanh.f32 %v460_v43  ;;  %v462_v48 = vmul.f32 0.5, %v432_v44 }
 0x103   : > { %1274 = vtanh.f32 %v461_v46  ;;  %v463_v49 = vmul.f32 0.5, %v434_v47 }
 0x104   : > { %v1265_v50 = vpop.eup %1264  ;;  %1276 = vtanh.f32 %v462_v48 }
 0x105   : > { %v1267_v51 = vpop.eup %1266  ;;  %1278 = vtanh.f32 %v463_v49  ;;  %v437_v53 = vpop.f32.mrb[8].mxu0  ;;  %v488_v54 = vmul.f32 0.5, %v1265_v50 }
 0x106   : > { %v1269_v55 = vpop.eup %1268  ;;  %v438_v56 = vadd.f32 %v437_v53, %v318_v52  ;;  %v439_v57 = vpop.f32.mrb[9].mxu0  ;;  %v489_v58 = vmul.f32 0.5, %v1267_v51 }
 0x107   : > { %v1271_v59 = vpop.eup %1270  ;;  %v440_v61 = vadd.f32 %v439_v57, %v318_v52  ;;  %v441_v62 = vpop.f32.mrb[10].mxu0  ;;  %v490_v63 = vmul.f32 0.5, %v1269_v55  ;;  %v504_v11 = vadd.f32 0.5, %v488_v54 }
 0x108   : > { %v464_v1 = vmul.f32 0.5, %v438_v56  ;;  %v442_v2 = vadd.f32 %v441_v62, %v323_v60  ;;  %v443_v5 = vpop.f32.mrb[11].mxu0  ;;  %v491_v6 = vmul.f32 0.5, %v1271_v59  ;;  %v505_v14 = vadd.f32 0.5, %v489_v58 }
 0x109   : > { %v465_v8 = vmul.f32 0.5, %v440_v61  ;;  %v444_v9 = vadd.f32 %v443_v5, %v323_v60  ;;  %v506_v12 = vadd.f32 0.5, %v490_v63 }
 0x10a   : > { %1280 = vtanh.f32 %v464_v1  ;;  %v466_v13 = vmul.f32 0.5, %v442_v2  ;;  %v507_v15 = vadd.f32 0.5, %v491_v6 }
 0x10b   : > { %1282 = vtanh.f32 %v465_v8  ;;  %v467_v16 = vmul.f32 0.5, %v444_v9  ;;  %v528_v17 = vpack.c.bf16 %v506_v12, %v504_v11 }
 0x10c   : > { %v1273_v18 = vpop.eup %1272  ;;  %1284 = vtanh.f32 %v466_v13  ;;  %v529_v19 = vpack.c.bf16 %v507_v15, %v505_v14 }
 0x10d   : > { %v1275_v20 = vpop.eup %1274  ;;  %v492_v21 = vmul.f32 0.5, %v1273_v18  ;;  %1286 = vtanh.f32 %v467_v16  ;;  %v447_v23 = vpop.f32.mrb[12].mxu0  ;;  %v1256_v16 = vld [vmem:[%s1697_s2] sm:$0xff]   ;;  %v1258_v18 = vld [vmem:[%s1697_s2 + $0x10] sm:$0xff]  }
 0x10e   : > { %v1277_v24 = vpop.eup %1276  ;;  %v493_v25 = vmul.f32 0.5, %v1275_v20  ;;  %v448_v26 = vadd.f32 %v447_v23, %v328_v22  ;;  %v449_v27 = vpop.f32.mrb[13].mxu0  ;;  %601 = vmatprep.subr.bf16.mxu1 %v529_v19  ;;  %v1259_v19 = vld [vmem:[%s1697_s2 + $0x18] sm:$0xff]   ;;  %v1427_v20 = vmov 2  }
 0x10f   : > { %v1279_v28 = vpop.eup %1278  ;;  %v494_v29 = vmul.f32 0.5, %v1277_v24  ;;  %v450_v31 = vadd.f32 %v449_v27, %v328_v22  ;;  %v451_v32 = vpop.f32.mrb[14].mxu0  ;;  %602 = vmatpush1.bf16.msra.mxu1 %v528_v17  ;;  %v508_v37 = vadd.f32 0.5, %v492_v21  ;;  %v1257_v17 = vld [vmem:[%s1697_s2 + $0x8] sm:$0xff]   ;;  %1243 = vset.pattern.permute.xlu1 %v1427_v20 }
 0x110   : > { %v495_v33 = vmul.f32 0.5, %v1279_v28  ;;  %v468_v34 = vmul.f32 0.5, %v448_v26  ;;  %v452_v35 = vadd.f32 %v451_v32, %v333_v30  ;;  %v453_v36 = vpop.f32.mrb[15].mxu0  ;;  %v509_v41 = vadd.f32 0.5, %v493_v25  ;;  %1244 = vset.pattern.permute.xlu0 %v1427_v20  ;;  %751 = vperm.xlu1 %1243, %v1527_v3   ;;  %v538_v21 = vpop.permute.xlu0 %537 }
 0x111   : > { %v510_v38 = vadd.f32 0.5, %v494_v29  ;;  %v469_v39 = vmul.f32 0.5, %v450_v31  ;;  %v454_v40 = vadd.f32 %v453_v36, %v333_v30  ;;  %755 = vperm.xlu0 %1244, %v1541_v7   ;;  %v542_v23 = vpop.permute.xlu1 %541 }
 0x112   : > { %v511_v42 = vadd.f32 0.5, %v495_v33  ;;  %1288 = vtanh.f32 %v468_v34  ;;  %v470_v43 = vmul.f32 0.5, %v452_v35 }
 0x113   : > { %1290 = vtanh.f32 %v469_v39  ;;  %v471_v44 = vmul.f32 0.5, %v454_v40  ;;  %v530_v45 = vpack.c.bf16 %v510_v38, %v508_v37 }
 0x114   : > { %v1281_v46 = vpop.eup %1280  ;;  %1292 = vtanh.f32 %v470_v43  ;;  %v531_v47 = vpack.c.bf16 %v511_v42, %v509_v41  ;;  %759 = vperm.xlu1 %1243, %v1536_v4   ;;  %v550_v39 = vpop.permute.xlu0 %549 }
 0x115   : > { %v1283_v48 = vpop.eup %1282  ;;  %v496_v49 = vmul.f32 0.5, %v1281_v46  ;;  %1294 = vtanh.f32 %v471_v44  ;;  %v546_v35 = vpop.permute.xlu1 %545 }
 0x116   : > { %v1285_v50 = vpop.eup %1284  ;;  %v497_v51 = vmul.f32 0.5, %v1283_v48  ;;  %603 = vmatprep.subr.bf16.mxu1 %v531_v47 }
 0x117   : > { %v1287_v52 = vpop.eup %1286  ;;  %v498_v53 = vmul.f32 0.5, %v1285_v50  ;;  %604 = vmatpush1.bf16.msra.mxu1 %v530_v45  ;;  %v512_v55 = vadd.f32 0.5, %v496_v49 }
 0x118   : > { %v499_v54 = vmul.f32 0.5, %v1287_v52  ;;  %v513_v57 = vadd.f32 0.5, %v497_v51  ;;  %763 = vperm.xlu1 %1243, %v1547_v10  }
 0x119   : > { %v514_v56 = vadd.f32 0.5, %v498_v53  ;;  %v554_v52 = vpop.permute.xlu1 %553 }
 0x11a   : > { %v515_v58 = vadd.f32 0.5, %v499_v54 }
 0x11b   : > { %v532_v59 = vpack.c.bf16 %v514_v56, %v512_v55 }
 0x11c   : > { %v1289_v60 = vpop.eup %1288  ;;  %v533_v61 = vpack.c.bf16 %v515_v58, %v513_v57 }
 0x11d   : > { %v1291_v62 = vpop.eup %1290  ;;  %v500_v63 = vmul.f32 0.5, %v1289_v60  ;;  %v558_v60 = vpop.permute.xlu0 %557 }
 0x11e   : > { %v1293_v1 = vpop.eup %1292  ;;  %v501_v2 = vmul.f32 0.5, %v1291_v62  ;;  %605 = vmatprep.subr.bf16.mxu1 %v533_v61 }
 0x11f   : > { %v1295_v5 = vpop.eup %1294  ;;  %v502_v6 = vmul.f32 0.5, %v1293_v1  ;;  %606 = vmatpush1.bf16.msra.mxu1 %v532_v59  ;;  %v516_v9 = vadd.f32 0.5, %v500_v63 }
 0x120   : > { %v503_v8 = vmul.f32 0.5, %v1295_v5  ;;  %v517_v12 = vadd.f32 0.5, %v501_v2 }
 0x121   : > { %v518_v11 = vadd.f32 0.5, %v502_v6 }
 0x122   : > { %v519_v13 = vadd.f32 0.5, %v503_v8 }
 0x123   : > { %v534_v14 = vpack.c.bf16 %v518_v11, %v516_v9 }
 0x124   : > { %v535_v15 = vpack.c.bf16 %v519_v13, %v517_v12 }
 0x126   : > { %607 = vmatprep.subr.bf16.mxu1 %v535_v15 }
 0x127   : > { %608 = vmatpush1.bf16.msra.mxu1 %v534_v14 }
 0x12a   : > { %1167 = vmatmul.mubr.msk.bf16.vlgmr.msra.gmra.mrb[0].mxu1 %vm588_vm3, %v1256_v16 }
 0x12b   : > { %643 = vmatprep.mubr.bf16.mxu1 %v1424_v0 }
 0x132   : > { %1168 = vmatmul.mubr.msk.bf16.gmra.mrb[4].mxu1 %vm588_vm3, %v1257_v17 }
 0x133   : > { %653 = vmatprep.mubr.bf16.mxu1 %v1424_v0 }
 0x13a   : > { %1169 = vmatmul.mubr.msk.bf16.gmra.mrb[8].mxu1 %vm588_vm3, %v1258_v18 }
 0x13b   : > { %663 = vmatprep.mubr.bf16.mxu1 %v1424_v0 }
 0x142   : > { %1170 = vmatmul.mubr.msk.bf16.gmra.mrb[12].mxu1 %vm588_vm3, %v1259_v19 }
 0x143   : > { %950 = vmatprep.mubr.bf16.mxu1 %v1424_v0 }
 0x1fd   : > { %v635_v22 = vpop.f32.mrb[0].mxu1 }
 0x1fe   : > { %v636_v24 = vadd.f32 %v635_v22, %v538_v21  ;;  %v637_v25 = vpop.f32.mrb[1].mxu1 }
 0x1ff   : > { %v638_v26 = vadd.f32 %v637_v25, %v538_v21  ;;  %v639_v27 = vpop.f32.mrb[2].mxu1  ;;  %v562_v21 = vpop.permute.xlu1 %561 }
 0x200   : > { %v674_v28 = vmul.f32 0.5, %v636_v24  ;;  %v640_v29 = vadd.f32 %v639_v27, %v542_v23  ;;  %v641_v30 = vpop.f32.mrb[3].mxu1 }
 0x201   : > { %v675_v31 = vmul.f32 0.5, %v638_v26  ;;  %v642_v32 = vadd.f32 %v641_v30, %v542_v23 }
 0x202   : > { %1296 = vtanh.f32 %v674_v28  ;;  %v676_v33 = vmul.f32 0.5, %v640_v29  ;;  %v566_v29 = vpop.permute.xlu0 %565 }
 0x203   : > { %1298 = vtanh.f32 %v675_v31  ;;  %v677_v34 = vmul.f32 0.5, %v642_v32 }
 0x204   : > { %1300 = vtanh.f32 %v676_v33 }
 0x205   : > { %1302 = vtanh.f32 %v677_v34  ;;  %v645_v36 = vpop.f32.mrb[4].mxu1 }
 0x206   : > { %v646_v37 = vadd.f32 %v645_v36, %v546_v35  ;;  %v647_v38 = vpop.f32.mrb[5].mxu1 }
 0x207   : > { %v648_v40 = vadd.f32 %v647_v38, %v546_v35  ;;  %v649_v41 = vpop.f32.mrb[6].mxu1 }
 0x208   : > { %v678_v42 = vmul.f32 0.5, %v646_v37  ;;  %v650_v43 = vadd.f32 %v649_v41, %v550_v39  ;;  %v651_v44 = vpop.f32.mrb[7].mxu1 }
 0x209   : > { %v679_v45 = vmul.f32 0.5, %v648_v40  ;;  %v652_v46 = vadd.f32 %v651_v44, %v550_v39 }
 0x20a   : > { %1304 = vtanh.f32 %v678_v42  ;;  %v680_v47 = vmul.f32 0.5, %v650_v43 }
 0x20b   : > { %1306 = vtanh.f32 %v679_v45  ;;  %v681_v48 = vmul.f32 0.5, %v652_v46 }
 0x20c   : > { %v1297_v49 = vpop.eup %1296  ;;  %1308 = vtanh.f32 %v680_v47 }
 0x20d   : > { %v1299_v50 = vpop.eup %1298  ;;  %v706_v51 = vmul.f32 0.5, %v1297_v49  ;;  %1310 = vtanh.f32 %v681_v48  ;;  %v655_v53 = vpop.f32.mrb[8].mxu1 }
 0x20e   : > { %v1301_v54 = vpop.eup %1300  ;;  %v707_v55 = vmul.f32 0.5, %v1299_v50  ;;  %v656_v56 = vadd.f32 %v655_v53, %v554_v52  ;;  %v657_v57 = vpop.f32.mrb[9].mxu1 }
 0x20f   : > { %v1303_v58 = vpop.eup %1302  ;;  %v708_v59 = vmul.f32 0.5, %v1301_v54  ;;  %v658_v61 = vadd.f32 %v657_v57, %v554_v52  ;;  %v659_v62 = vpop.f32.mrb[10].mxu1  ;;  %v722_v6 = vadd.f32 0.5, %v706_v51 }
 0x210   : > { %v709_v63 = vmul.f32 0.5, %v1303_v58  ;;  %v682_v1 = vmul.f32 0.5, %v656_v56  ;;  %v660_v2 = vadd.f32 %v659_v62, %v558_v60  ;;  %v661_v5 = vpop.f32.mrb[11].mxu1  ;;  %v723_v12 = vadd.f32 0.5, %v707_v55 }
 0x211   : > { %v724_v8 = vadd.f32 0.5, %v708_v59  ;;  %v683_v9 = vmul.f32 0.5, %v658_v61  ;;  %v662_v11 = vadd.f32 %v661_v5, %v558_v60 }
 0x212   : > { %v725_v13 = vadd.f32 0.5, %v709_v63  ;;  %1312 = vtanh.f32 %v682_v1  ;;  %v684_v14 = vmul.f32 0.5, %v660_v2 }
 0x213   : > { %v742_v15 = vpack.c.bf16 %v724_v8, %v722_v6  ;;  %1314 = vtanh.f32 %v683_v9  ;;  %v685_v16 = vmul.f32 0.5, %v662_v11 }
 0x214   : > { %v1305_v17 = vpop.eup %1304  ;;  %1316 = vtanh.f32 %v684_v14  ;;  %v743_v18 = vpack.c.bf16 %v725_v13, %v723_v12 }
 0x215   : > { %v1307_v19 = vpop.eup %1306  ;;  %v710_v20 = vmul.f32 0.5, %v1305_v17  ;;  %1318 = vtanh.f32 %v685_v16  ;;  %v665_v22 = vpop.f32.mrb[12].mxu1  ;;  %v1261_v16 = vld [vmem:[%s1698_s3 + $0x8] sm:$0xff]   ;;  %v1428_v17 = vmov 3  }
 0x216   : > { %v1309_v23 = vpop.eup %1308  ;;  %v711_v24 = vmul.f32 0.5, %v1307_v19  ;;  %v666_v25 = vadd.f32 %v665_v22, %v562_v21  ;;  %v667_v26 = vpop.f32.mrb[13].mxu1  ;;  %782 = vmatprep.subr.bf16.mxu0 %v743_v18  ;;  %1246 = vset.pattern.permute.xlu1 %v1428_v17  ;;  %v1429_v18 = vmov 4  }
 0x217   : > { %v1311_v27 = vpop.eup %1310  ;;  %v712_v28 = vmul.f32 0.5, %v1309_v23  ;;  %v668_v30 = vadd.f32 %v667_v26, %v562_v21  ;;  %v669_v31 = vpop.f32.mrb[14].mxu1  ;;  %783 = vmatpush1.bf16.msra.mxu0 %v742_v15  ;;  %v726_v36 = vadd.f32 0.5, %v710_v20  ;;  %v1260_v15 = vld [vmem:[%s1698_s3] sm:$0xff]   ;;  %1245 = vset.pattern.permute.xlu0 %v1428_v17 }
 0x218   : > { %v713_v32 = vmul.f32 0.5, %v1311_v27  ;;  %v686_v33 = vmul.f32 0.5, %v666_v25  ;;  %v670_v34 = vadd.f32 %v669_v31, %v566_v29  ;;  %v671_v35 = vpop.f32.mrb[15].mxu1  ;;  %v727_v40 = vadd.f32 0.5, %v711_v24  ;;  %880 = vperm.xlu1 %1246, %v1541_v7   ;;  %876 = vperm.xlu0 %1245, %v1527_v3   ;;  %v752_v19 = vpop.permute.xlu1 %751 }
 0x219   : > { %v728_v37 = vadd.f32 0.5, %v712_v28  ;;  %v687_v38 = vmul.f32 0.5, %v668_v30  ;;  %v672_v39 = vadd.f32 %v671_v35, %v566_v29  ;;  %v756_v21 = vpop.permute.xlu0 %755 }
 0x21a   : > { %v729_v41 = vadd.f32 0.5, %v713_v32  ;;  %1320 = vtanh.f32 %v686_v33  ;;  %v688_v42 = vmul.f32 0.5, %v670_v34 }
 0x21b   : > { %v744_v43 = vpack.c.bf16 %v728_v37, %v726_v36  ;;  %1322 = vtanh.f32 %v687_v38  ;;  %v689_v44 = vmul.f32 0.5, %v672_v39 }
 0x21c   : > { %v1313_v45 = vpop.eup %1312  ;;  %1324 = vtanh.f32 %v688_v42  ;;  %v745_v46 = vpack.c.bf16 %v729_v41, %v727_v40  ;;  %884 = vperm.xlu1 %1246, %v1536_v4   ;;  %888 = vperm.xlu0 %1245, %v1547_v10   ;;  %v760_v29 = vpop.permute.xlu1 %759 }
 0x21d   : > { %v1315_v47 = vpop.eup %1314  ;;  %v714_v48 = vmul.f32 0.5, %v1313_v45  ;;  %1326 = vtanh.f32 %v689_v44 }
 0x21e   : > { %v1317_v49 = vpop.eup %1316  ;;  %v715_v50 = vmul.f32 0.5, %v1315_v47  ;;  %784 = vmatprep.subr.bf16.mxu0 %v745_v46 }
 0x21f   : > { %v1319_v51 = vpop.eup %1318  ;;  %v716_v52 = vmul.f32 0.5, %v1317_v49  ;;  %785 = vmatpush1.bf16.msra.mxu0 %v744_v43  ;;  %v730_v54 = vadd.f32 0.5, %v714_v48 }
 0x220   : > { %v717_v53 = vmul.f32 0.5, %v1319_v51  ;;  %v731_v56 = vadd.f32 0.5, %v715_v50  ;;  %1247 = vset.pattern.permute.xlu1 %v1429_v18  ;;  %1248 = vset.pattern.permute.xlu0 %v1429_v18  ;;  %v764_v33 = vpop.permute.xlu1 %763 }
 0x221   : > { %v732_v55 = vadd.f32 0.5, %v716_v52  ;;  %994 = vperm.xlu1 %1247, %v1527_v3   ;;  %998 = vperm.xlu0 %1248, %v1541_v7  }
 0x222   : > { %v733_v57 = vadd.f32 0.5, %v717_v53 }
 0x223   : > { %v746_v58 = vpack.c.bf16 %v732_v55, %v730_v54 }
 0x224   : > { %v1321_v59 = vpop.eup %1320  ;;  %v747_v60 = vpack.c.bf16 %v733_v57, %v731_v56 }
 0x225   : > { %v1323_v61 = vpop.eup %1322  ;;  %v718_v62 = vmul.f32 0.5, %v1321_v59  ;;  %1002 = vperm.xlu1 %1247, %v1536_v4  }
 0x226   : > { %v1325_v63 = vpop.eup %1324  ;;  %v719_v1 = vmul.f32 0.5, %v1323_v61  ;;  %786 = vmatprep.subr.bf16.mxu0 %v747_v60 }
 0x227   : > { %v1327_v2 = vpop.eup %1326  ;;  %v720_v5 = vmul.f32 0.5, %v1325_v63  ;;  %787 = vmatpush1.bf16.msra.mxu0 %v746_v58  ;;  %v734_v8 = vadd.f32 0.5, %v718_v62 }
 0x228   : > { %v721_v6 = vmul.f32 0.5, %v1327_v2  ;;  %v735_v11 = vadd.f32 0.5, %v719_v1 }
 0x229   : > { %v736_v9 = vadd.f32 0.5, %v720_v5  ;;  %1006 = vperm.xlu1 %1247, %v1547_v10  }
 0x22a   : > { %v737_v12 = vadd.f32 0.5, %v721_v6 }
 0x22b   : > { %v748_v13 = vpack.c.bf16 %v736_v9, %v734_v8 }
 0x22c   : > { %v749_v14 = vpack.c.bf16 %v737_v12, %v735_v11  ;;  %v1262_v12 = vld [vmem:[%s1699_s4] sm:$0xff]  }
 0x22e   : > { %788 = vmatprep.subr.bf16.mxu0 %v749_v14 }
 0x22f   : > { %789 = vmatpush1.bf16.msra.mxu0 %v748_v13  ;;  %v1263_v13 = vld [vmem:[%s1699_s4 + $0x8] sm:$0xff]  }
 0x232   : > { %1173 = vmatmul.mubr.msk.bf16.vlgmr.msra.gmra.mrb[16].mxu0 %vm588_vm3, %v1260_v15 }
 0x233   : > { %824 = vmatprep.mubr.bf16.mxu0 %v1424_v0 }
 0x23a   : > { %1174 = vmatmul.mubr.msk.bf16.gmra.mrb[20].mxu0 %vm588_vm3, %v1261_v16 }
 0x23b   : > { %940 = vmatprep.mubr.bf16.mxu0 %v1424_v0  ;;  %v1430_v0 = vmov 5  }
 0x23c   : > { %1249 = vset.pattern.permute.xlu0 %v1430_v0 }
 0x23d   : > { %1049 = vperm.xlu0 %1249, %v1527_v3  }
 0x297   : > { %v881_v14 = vpop.permute.xlu1 %880  ;;  %v877_v15 = vpop.permute.xlu0 %876 }
 0x29b   : > { %v885_v16 = vpop.permute.xlu1 %884  ;;  %v889_v17 = vpop.permute.xlu0 %888 }
 0x305   : > { %v816_v20 = vpop.f32.mrb[16].mxu0 }
 0x306   : > { %v817_v22 = vadd.f32 %v816_v20, %v752_v19  ;;  %v818_v23 = vpop.f32.mrb[17].mxu0 }
 0x307   : > { %v819_v24 = vadd.f32 %v818_v23, %v752_v19  ;;  %v820_v25 = vpop.f32.mrb[18].mxu0 }
 0x308   : > { %v835_v26 = vmul.f32 0.5, %v817_v22  ;;  %v821_v27 = vadd.f32 %v820_v25, %v756_v21  ;;  %v822_v28 = vpop.f32.mrb[19].mxu0 }
 0x309   : > { %v836_v7 = vmul.f32 0.5, %v819_v24  ;;  %v823_v30 = vadd.f32 %v822_v28, %v756_v21 }
 0x30a   : > { %1328 = vtanh.f32 %v835_v26  ;;  %v837_v4 = vmul.f32 0.5, %v821_v27 }
 0x30b   : > { %1330 = vtanh.f32 %v836_v7  ;;  %v838_v31 = vmul.f32 0.5, %v823_v30 }
 0x30c   : > { %1332 = vtanh.f32 %v837_v4 }
 0x30d   : > { %1334 = vtanh.f32 %v838_v31  ;;  %v826_v3 = vpop.f32.mrb[20].mxu0 }
 0x30e   : > { %v827_v10 = vadd.f32 %v826_v3, %v760_v29  ;;  %v828_v32 = vpop.f32.mrb[21].mxu0 }
 0x30f   : > { %v829_v34 = vadd.f32 %v828_v32, %v760_v29  ;;  %v830_v35 = vpop.f32.mrb[22].mxu0 }
 0x310   : > { %v839_v36 = vmul.f32 0.5, %v827_v10  ;;  %v831_v37 = vadd.f32 %v830_v35, %v764_v33  ;;  %v832_v38 = vpop.f32.mrb[23].mxu0 }
 0x311   : > { %v840_v39 = vmul.f32 0.5, %v829_v34  ;;  %v833_v40 = vadd.f32 %v832_v38, %v764_v33 }
 0x312   : > { %1336 = vtanh.f32 %v839_v36  ;;  %v841_v41 = vmul.f32 0.5, %v831_v37  ;;  %v995_v37 = vpop.permute.xlu1 %994 }
 0x313   : > { %1338 = vtanh.f32 %v840_v39  ;;  %v842_v42 = vmul.f32 0.5, %v833_v40 }
 0x314   : > { %v1329_v43 = vpop.eup %1328  ;;  %1340 = vtanh.f32 %v841_v41 }
 0x315   : > { %v1331_v44 = vpop.eup %1330  ;;  %v851_v45 = vmul.f32 0.5, %v1329_v43  ;;  %1342 = vtanh.f32 %v842_v42 }
 0x316   : > { %v1333_v46 = vpop.eup %1332  ;;  %v852_v47 = vmul.f32 0.5, %v1331_v44 }
 0x317   : > { %v1335_v48 = vpop.eup %1334  ;;  %v853_v49 = vmul.f32 0.5, %v1333_v46  ;;  %v859_v51 = vadd.f32 0.5, %v851_v45  ;;  %v1003_v45 = vpop.permute.xlu1 %1002 }
 0x318   : > { %v854_v50 = vmul.f32 0.5, %v1335_v48  ;;  %v860_v53 = vadd.f32 0.5, %v852_v47 }
 0x319   : > { %v861_v52 = vadd.f32 0.5, %v853_v49  ;;  %v999_v49 = vpop.permute.xlu0 %998 }
 0x31a   : > { %v862_v54 = vadd.f32 0.5, %v854_v50 }
 0x31b   : > { %v871_v55 = vpack.c.bf16 %v861_v52, %v859_v51 }
 0x31c   : > { %v1337_v56 = vpop.eup %1336  ;;  %v872_v57 = vpack.c.bf16 %v862_v54, %v860_v53 }
 0x31d   : > { %v1339_v58 = vpop.eup %1338  ;;  %v855_v59 = vmul.f32 0.5, %v1337_v56 }
 0x31e   : > { %v1341_v60 = vpop.eup %1340  ;;  %v856_v61 = vmul.f32 0.5, %v1339_v58  ;;  %908 = vmatprep.subr.bf16.mxu0 %v872_v57  ;;  %1190 = vmatprep.subr.bf16.mxu1 %v872_v57 }
 0x31f   : > { %v1343_v62 = vpop.eup %1342  ;;  %v857_v63 = vmul.f32 0.5, %v1341_v60  ;;  %909 = vmatpush1.bf16.msra.mxu0 %v871_v55  ;;  %1192 = vmatpush1.bf16.msra.mxu1 %v871_v55  ;;  %v863_v2 = vadd.f32 0.5, %v855_v59 }
 0x320   : > { %v858_v1 = vmul.f32 0.5, %v1343_v62  ;;  %v864_v6 = vadd.f32 0.5, %v856_v61 }
 0x321   : > { %v865_v5 = vadd.f32 0.5, %v857_v63 }
 0x322   : > { %v866_v8 = vadd.f32 0.5, %v858_v1  ;;  %v1007_v1 = vpop.permute.xlu1 %1006 }
 0x323   : > { %v873_v9 = vpack.c.bf16 %v865_v5, %v863_v2 }
 0x324   : > { %v874_v11 = vpack.c.bf16 %v866_v8, %v864_v6 }
 0x326   : > { %910 = vmatprep.subr.bf16.mxu0 %v874_v11  ;;  %1191 = vmatprep.subr.bf16.mxu1 %v874_v11 }
 0x327   : > { %911 = vmatpush1.bf16.msra.mxu0 %v873_v9  ;;  %1193 = vmatpush1.bf16.msra.mxu1 %v873_v9 }
 0x32a   : > { %1177 = vmatmul.mubr.msk.bf16.vlgmr.msra.gmra.mrb[24].mxu0 %vm901_vm4, %v1262_v12  ;;  %1178 = vmatmul.mubr.msk.bf16.vlgmr.msra.gmra.mrb[16].mxu1 %vm901_vm4, %v1263_v13 }
 0x3fd   : > { %v942_v18 = vpop.f32.mrb[24].mxu0  ;;  %v952_v0 = vpop.f32.mrb[16].mxu1 }
 0x3fe   : > { %v943_v19 = vadd.f32 %v942_v18, %v877_v15  ;;  %v944_v20 = vpop.f32.mrb[25].mxu0  ;;  %v954_v21 = vpop.f32.mrb[17].mxu1  ;;  %v953_v22 = vadd.f32 %v952_v0, %v885_v16 }
 0x3ff   : > { %v945_v23 = vadd.f32 %v944_v20, %v877_v15  ;;  %v946_v24 = vpop.f32.mrb[26].mxu0  ;;  %v956_v25 = vpop.f32.mrb[18].mxu1  ;;  %v955_v26 = vadd.f32 %v954_v21, %v885_v16 }
 0x400   : > { %v961_v27 = vmul.f32 0.5, %v943_v19  ;;  %v947_v28 = vadd.f32 %v946_v24, %v881_v14  ;;  %v957_v29 = vadd.f32 %v956_v25, %v889_v17  ;;  %v948_v7 = vpop.f32.mrb[27].mxu0  ;;  %v958_v30 = vpop.f32.mrb[19].mxu1  ;;  %v965_v31 = vmul.f32 0.5, %v953_v22 }
 0x401   : > { %v962_v4 = vmul.f32 0.5, %v945_v23  ;;  %v949_v3 = vadd.f32 %v948_v7, %v881_v14  ;;  %v959_v10 = vadd.f32 %v958_v30, %v889_v17  ;;  %v966_v33 = vmul.f32 0.5, %v955_v26 }
 0x402   : > { %1344 = vtanh.f32 %v961_v27  ;;  %v963_v32 = vmul.f32 0.5, %v947_v28  ;;  %v967_v34 = vmul.f32 0.5, %v957_v29 }
 0x403   : > { %1346 = vtanh.f32 %v962_v4  ;;  %v964_v35 = vmul.f32 0.5, %v949_v3  ;;  %v968_v36 = vmul.f32 0.5, %v959_v10 }
 0x404   : > { %1348 = vtanh.f32 %v963_v32 }
 0x405   : > { %1350 = vtanh.f32 %v965_v31 }
 0x406   : > { %1352 = vtanh.f32 %v966_v33  ;;  %v1050_v33 = vpop.permute.xlu0 %1049 }
 0x407   : > { %1354 = vtanh.f32 %v967_v34 }
 0x408   : > { %1356 = vtanh.f32 %v964_v35 }
 0x409   : > { %1358 = vtanh.f32 %v968_v36 }
 0x40c   : > { %v1345_v38 = vpop.eup %1344 }
 0x40d   : > { %v1347_v39 = vpop.eup %1346  ;;  %v977_v40 = vmul.f32 0.5, %v1345_v38 }
 0x40e   : > { %v1349_v41 = vpop.eup %1348  ;;  %v978_v43 = vmul.f32 0.5, %v1347_v39 }
 0x40f   : > { %v1351_v42 = vpop.eup %1350  ;;  %v985_v44 = vadd.f32 0.5, %v977_v40  ;;  %v979_v46 = vmul.f32 0.5, %v1349_v41 }
 0x410   : > { %v1353_v47 = vpop.eup %1352  ;;  %v981_v48 = vmul.f32 0.5, %v1351_v42  ;;  %v986_v57 = vadd.f32 0.5, %v978_v43 }
 0x411   : > { %v1355_v50 = vpop.eup %1354  ;;  %v982_v51 = vmul.f32 0.5, %v1353_v47  ;;  %v987_v52 = vadd.f32 0.5, %v979_v46  ;;  %v1009_v58 = vmul.f32 %v995_v37, %v985_v44 }
 0x412   : > { %v1357_v53 = vpop.eup %1356  ;;  %v989_v54 = vadd.f32 0.5, %v981_v48  ;;  %v983_v55 = vmul.f32 0.5, %v1355_v50  ;;  %v1010_v11 = vmul.f32 %v995_v37, %v986_v57 }
 0x413   : > { %v1359_v56 = vpop.eup %1358  ;;  %v980_v59 = vmul.f32 0.5, %v1357_v53  ;;  %v1011_v60 = vmul.f32 %v999_v49, %v987_v52  ;;  %v990_v61 = vadd.f32 0.5, %v982_v51 }
 0x414   : > { %v984_v62 = vmul.f32 0.5, %v1359_v56  ;;  %v991_v63 = vadd.f32 0.5, %v983_v55  ;;  %v1013_v6 = vmul.f32 %v1003_v45, %v989_v54 }
 0x415   : > { %v988_v2 = vadd.f32 0.5, %v980_v59  ;;  %v1017_v5 = vadd.f32 %v1011_v60, %v1009_v58  ;;  %v1014_v14 = vmul.f32 %v1003_v45, %v990_v61 }
 0x416   : > { %v992_v8 = vadd.f32 0.5, %v984_v62  ;;  %v1015_v9 = vmul.f32 %v1007_v1, %v991_v63 }
 0x417   : > { %v1012_v12 = vmul.f32 %v999_v49, %v988_v2  ;;  %v1018_v13 = vrot.slane %v1017_v5, 4 }
 0x418   : > { %v1016_v15 = vmul.f32 %v1007_v1, %v992_v8  ;;  %v1031_v16 = vadd.f32 %v1015_v9, %v1013_v6 }
 0x419   : > { %v1019_v17 = vadd.f32 %v1018_v13, %v1017_v5  ;;  %v1024_v18 = vadd.f32 %v1012_v12, %v1010_v11 }
 0x41a   : > { %v1032_v0 = vrot.slane %v1031_v16, 4  ;;  %v1038_v19 = vadd.f32 %v1016_v15, %v1014_v14 }
 0x41b   : > { %v1020_v20 = vrot.slane %v1019_v17, 2  ;;  %v1025_v21 = vrot.slane %v1024_v18, 4 }
 0x41c   : > { %v1033_v22 = vadd.f32 %v1032_v0, %v1031_v16  ;;  %v1039_v23 = vrot.slane %v1038_v19, 4 }
 0x41d   : > { %v1021_v24 = vadd.f32 %v1020_v20, %v1019_v17  ;;  %v1026_v25 = vadd.f32 %v1025_v21, %v1024_v18 }
 0x41e   : > { %v1034_v26 = vrot.slane %v1033_v22, 2  ;;  %v1040_v27 = vadd.f32 %v1039_v23, %v1038_v19 }
 0x41f   : > { %v1027_v28 = vrot.slane %v1026_v25, 2  ;;  %v1022_v29 = vrot.slane %v1021_v24, 1 }
 0x420   : > { %v1035_v7 = vadd.f32 %v1034_v26, %v1033_v22  ;;  %v1041_v30 = vrot.slane %v1040_v27, 2 }
 0x421   : > { %v1028_v4 = vadd.f32 %v1027_v28, %v1026_v25  ;;  %v1023_v3 = vadd.f32 %v1022_v29, %v1021_v24 }
 0x422   : > { %v1042_v31 = vadd.f32 %v1041_v30, %v1040_v27  ;;  %v1036_v10 = vrot.slane %v1035_v7, 1 }
 0x423   : > { %v1029_v32 = vrot.slane %v1028_v4, 1 }
 0x424   : > { %v1037_v34 = vadd.f32 %v1036_v10, %v1035_v7  ;;  %v1043_v35 = vrot.slane %v1042_v31, 1 }
 0x425   : > { %v1030_v36 = vadd.f32 %v1029_v32, %v1028_v4 }
 0x426   : > { %v1044_v37 = vadd.f32 %v1043_v35, %v1042_v31  ;;  %v1046_v38 = vsel %vm1045_vm5, %v1023_v3, %v1037_v34 }
 0x427   : > { %v1052_v39 = vadd.f32 %v1050_v33, %v1046_v38  ;;  %1073 = sbr.rel (!%p1505_p5) target bundleno = 1097 (0x449), region = 48 }
 0x428   : > { %v1047_v40 = vsel %vm1045_vm5, %v1030_v36, %v1044_v37 }
 0x429   : > { %v1053_v41 = vadd.f32 %v1050_v33, %v1047_v40 }
 0x42b   : > { %v1056_v42 = vcombine.low %v1052_v39, %v1053_v41 }
 0x42d   : > { %1179 = vst.sshfl [vmem:[%s257_s15] sm:$0x33 pattern:$0x76325410] %v1056_v42 }
 0x42e   : > { %s1709_s17 = smov (!%p1076_p11, %s1075_s17), 2 }
 0x42f   : > { %s1646_s18 = sshll.u32 %s1709_s17, 5 }
 0x430   : > { %s1080_s19 = ssub.s32 64, %s1646_s18 }
 0x431   : > { %1081 = vsyncadd %s1641_s16, %s1080_s19  ;;  %p1183_p12 = scmp.ne.s32.totalorder %s1646_s18, 0  ;;  %s1189_s20 = sshll.u32 %s1488_s25, 6 }
 0x432   : > { %s1655_s7 = scalar_lea.hbm %s1701_s6, %s1189_s20  ;;  %s1087_s29 = sshll.u32 %s257_s15, 4  ;;  %s1088_s29 = int_to_ptr.vmem [resolvable:$true] %s1087_s29 }
 0x433   : > { %s1360_s9 = scalar_lea.vmem %s1088_s29, %s1646_s18  ;;  %s1431_s10 = smov [#allocation2]  }
 0x434   : > { %p1361_p13 = scmp.ne.s32.totalorder %s1088_s29, %s1360_s9  ;;  %s1364_s11 = sshll.u32 %s1431_s10, 4  ;;  %s1365_s11 = int_to_ptr.vmem [resolvable:$false] %s1364_s11 }
 0x435   : > { %s1366_s12 = scalar_lea.vmem %s1365_s11, 128  ;;  %p1367_p2 = scmp.lt.s32.totalorder %s1088_s29, %s1365_s11 }
 0x436   : > { %p1362_p0 = pnand %p1361_p13, %p1183_p12  ;;  %p1368_p3 = scmp.lt.s32.totalorder %s1366_s12, %s1360_s9 }
 0x438   : > { %p1363_p1 = pneg %p1362_p0  ;;  %p1369_p4 = por %p1368_p3, %p1367_p2 }
 0x43a   : > { %p1370_p5 = pnand %p1369_p4, %p1363_p1 }
 0x43c   : > { %1373 = shalt.err (!%p1370_p5)
}
 0x43d   : > { %s1374_s25 = scalar_lea.hbm %s1655_s7, %s1646_s18  ;;  %s1378_s15 = scalar_lea.hbm %s1701_s6, 96 }
 0x43e   : > { %p1375_p7 = scmp.ne.s32.totalorder %s1655_s7, %s1374_s25  ;;  %p1379_p10 = scmp.lt.u32.totalorder %s1655_s7, %s1701_s6 }
 0x43f   : > { %p1380_p11 = scmp.lt.u32.totalorder %s1378_s15, %s1374_s25  ;;  %p1382_p0 = scmp.lt.u32.totalorder %s1374_s25, %s1655_s7 }
 0x440   : > { %p1376_p8 = pnand %p1375_p7, %p1183_p12 }
 0x441   : > { %p1381_p13 = por %p1380_p11, %p1379_p10 }
 0x442   : > { %p1377_p9 = pneg %p1376_p8 }
 0x443   : > { %p1383_p1 = por %p1382_p0, %p1381_p13 }
 0x445   : > { %p1384_p2 = pnand %p1383_p1, %p1377_p9 }
 0x447   : > { %1387 = shalt.err (!%p1384_p2)
}
 0x448   : > { %1090 = dma.vmem_to_hbm [thread:$0]  (%p1183_p12), %s1088_s29, %s1646_s18, %s1655_s7, %s1641_s16  }
 0x449 PF: > { %p1199_p3 = scmp.ge.s32.totalorder %s1422_s24, 2  ;;  %s1099_s20 = sand.u32 1, %s1410_s21  }
 0x44a   : > { %s1100_s26 = scalar_lea.sflag [#allocation3], %s1099_s20 }
 0x44b   : > { %p1196_p4 = pnand %p1199_p3, %p1509_p6 }
 0x44d   : > { %1405 = dma.done.wait (!%p1196_p4), %s1100_s26, 64  }
 0x44e   : > { %1407 = vsyncadd (!%p1196_p4), %s1100_s26, 4294967232  ;;  %p16_p5 = scmp.ge.s32.totalorder %s1492_s27, 4   ;;  %s1704_s21 = smov %s1414_s22 }
 0x44f   : > { %s1705_s22 = smov %s1418_s23  ;;  %s1706_s23 = smov %s1503_s30 }
 0x450   : > { %s1707_s24 = smov %s1492_s27  ;;  %18 = sbr.rel (!%p16_p5) target bundleno = 3 (0x3), region = 79 }
 0x457   :  { %1105 = vsyncpa [#allocation3], 1 }
 0x458   :  { %1107 = vsyncpa [#allocation3 + $0x1], 1 }

</bundles_post_ra>
